<compile_context>
chip_gen: v6e
topology: v6e:2x2x1
jax: 0.10.0
libtpu: 0.0.40
codegen_flags: <defaults>
</compile_context>

<pallas_src>
import functools

import jax
import jax.numpy as jnp
from jax import lax
from jax.experimental import pallas as pl
from jax.experimental.pallas import tpu as pltpu


def _series_decomp_kernel(x_ref, res_ref, mean_ref, xpad_ref, *,
                          kernel_size, pad, l_chunk):
    # x_ref   : (bB, L, cC)           input block
    # res_ref : (bB, L, cC)           output: x - moving_mean
    # mean_ref: (bB, L, cC)           output: moving_mean
    # xpad_ref: (bB, L + 2*pad, cC)   VMEM scratch: replicate-padded copy of x
    bB, L, cC = x_ref.shape
    inv_k = 1.0 / kernel_size

    # --- replicate padding, fused into the kernel (VMEM only, no HBM pass) ---
    if pad > 0:
        xpad_ref[:, 0:pad, :] = jnp.broadcast_to(
            x_ref[:, 0:1, :], (bB, pad, cC))
        xpad_ref[:, pad + L:pad + L + pad, :] = jnp.broadcast_to(
            x_ref[:, L - 1:L, :], (bB, pad, cC))
    xpad_ref[:, pad:pad + L, :] = x_ref[...]
    # TODO(synk): on v7x (64 MiB VMEM) the full xpad copy could be avoided by
    # reading interior taps from x_ref and only materializing the 2*pad halo.

    def process_chunk(t0):
        # Window sum kept in values (vregs) — no VMEM accumulator traffic.
        acc = xpad_ref[:, pl.ds(t0, l_chunk), :].astype(jnp.float32)
        for k in range(1, kernel_size):
            acc = acc + xpad_ref[:, pl.ds(t0 + k, l_chunk), :].astype(jnp.float32)
        # TODO(synk): for very large kernel_size / bf16 I/O a prefix-sum
        # (log2 roll+add) or banded-ones MXU matmul would cut the K VALU adds.
        mean = acc * inv_k
        mean_ref[:, pl.ds(t0, l_chunk), :] = mean.astype(mean_ref.dtype)
        res_ref[:, pl.ds(t0, l_chunk), :] = (
            x_ref[:, pl.ds(t0, l_chunk), :].astype(jnp.float32) - mean
        ).astype(res_ref.dtype)

    n_chunks = L // l_chunk
    if n_chunks == 1:
        process_chunk(0)
    else:
        def body(ci, carry):
            process_chunk(pl.multiple_of(ci * l_chunk, l_chunk))
            return carry
        lax.fori_loop(0, n_chunks, body, 0)


def _vmem_sizes():
    """Generation-aware (budget, vmem_limit) in bytes."""
    phys = 64 * 1024 * 1024  # conservative fallback (v7x per-TC physical)
    try:
        info = pltpu.get_tpu_info()
        phys = int(getattr(info, "vmem_capacity_bytes", phys))
    except Exception:
        pass
    budget = min(phys // 2, 64 * 1024 * 1024)       # v5e/v6e: 64 MiB, v7x: 32 MiB
    limit = min((phys * 3) // 4, 96 * 1024 * 1024)  # explicit scoped-VMEM limit
    return budget, limit


def _choose_tiles(B, L, C, pad, itemsize, budget):
    """Pick (batch tile, channel tile) sized to the VMEM budget."""
    L_pad = L + 2 * pad

    def vmem_bytes(bb, cc):
        io = 3 * bb * L * cc * itemsize           # x block + 2 output blocks
        scratch = bb * L_pad * cc * itemsize      # replicate-padded copy
        return 2 * io + scratch                   # I/O blocks are double-buffered

    cC = 128 if C % 128 == 0 else C
    bB = 1
    # TODO(synk): if even the minimal block exceeds the budget (very long L on
    # v7x), an L-tiled path with a ±pad halo would be needed; not implemented.

    # Grow the channel tile first (bigger contiguous lane runs), then batch,
    # keeping >=2 grid steps so both v7x TensorCores stay fed.
    while (C % (cC * 2) == 0
           and vmem_bytes(bB, cC * 2) <= budget
           and (B // bB) * (C // (cC * 2)) >= 2):
        cC *= 2
    while (B % (bB * 2) == 0
           and vmem_bytes(bB * 2, cC) <= budget
           and (B // (bB * 2)) * (C // cC) >= 2):
        bB *= 2
    return bB, cC


def _choose_l_chunk(L, cC):
    """Largest divisor of L keeping the f32 accumulator ~16 vregs."""
    target_rows = max(8, (64 * 1024) // (cC * 4))
    if L <= target_rows:
        return L
    best = 1
    for d in range(1, target_rows + 1):
        if L % d == 0:
            best = d
    if best < 8:
        # No useful divisor (e.g. prime L): fall back to the full block and let
        # the compiler manage spills.
        return L
    return best


def _series_decomp_pallas(x, kernel_size):
    B, L, C = x.shape
    pad = (kernel_size - 1) // 2
    L_pad = L + 2 * pad
    itemsize = x.dtype.itemsize

    budget, vmem_limit = _vmem_sizes()
    bB, cC = _choose_tiles(B, L, C, pad, itemsize, budget)
    l_chunk = _choose_l_chunk(L, cC)
    grid = (B // bB, C // cC)

    kernel = functools.partial(_series_decomp_kernel,
                               kernel_size=kernel_size, pad=pad,
                               l_chunk=l_chunk)
    blk = pl.BlockSpec((bB, L, cC), lambda b, c: (b, 0, c))

    cost = pl.CostEstimate(
        flops=int(kernel_size) * B * L * C,
        transcendentals=0,
        bytes_accessed=3 * B * L * C * itemsize,
    )

    res, mean = pl.pallas_call(
        kernel,
        out_shape=(jax.ShapeDtypeStruct((B, L, C), x.dtype),   # res
                   jax.ShapeDtypeStruct((B, L, C), x.dtype)),  # moving_mean
        grid=grid,
        in_specs=[blk],
        out_specs=(blk, blk),
        scratch_shapes=[pltpu.VMEM((bB, L_pad, cC), x.dtype)],
        compiler_params=pltpu.CompilerParams(
            dimension_semantics=("parallel", "parallel"),
            vmem_limit_bytes=int(vmem_limit)),
        cost_estimate=cost,
    )(x)
    return res, mean


def series_decomp(x, kernel_size):
    """Pallas equivalent of PyTorch series_decomp.forward (stride=1).

    Returns (res, moving_mean), both with the shape of x = (B, L, C).
    """
    if kernel_size % 2 != 1:
        raise ValueError("series_decomp requires an odd kernel_size "
                         "(even kernels change the output length).")
    B, L, C = x.shape

    # Lane-dense relayout for small channel counts: fold B*C onto the lane
    # axis (the moving average runs along L, so columns stay independent).
    if C < 128 and (B * C) % 128 == 0 and B > 1:
        xr = jnp.transpose(x, (1, 0, 2)).reshape(1, L, B * C)
        res_r, mean_r = _series_decomp_pallas(xr, kernel_size)
        res = jnp.transpose(res_r.reshape(L, B, C), (1, 0, 2))
        mean = jnp.transpose(mean_r.reshape(L, B, C), (1, 0, 2))
        return res, mean

    return _series_decomp_pallas(x, kernel_size)


def _reference_series_decomp(x, kernel_size):
    """Pure-JAX reference reproducing the PyTorch semantics."""
    B, L, C = x.shape
    pad = (kernel_size - 1) // 2
    front = jnp.repeat(x[:, 0:1, :], pad, axis=1)
    end = jnp.repeat(x[:, -1:, :], pad, axis=1)
    xp = jnp.concatenate([front, x, end], axis=1)            # (B, L_pad, C)
    windows = jnp.stack(
        [xp[:, t:t + kernel_size, :] for t in range(L)], axis=1)  # (B, L, K, C)
    mean = jnp.mean(windows, axis=2)
    return x - mean, mean


if __name__ == "__main__":
    kernel_size = 25  # Autoformer's typical decomposition window, stride=1
    key = jax.random.PRNGKey(0)
    k1, k2 = jax.random.split(key)

    # Case 1: small batch*channels -> direct (B, L, C) path.
    B, L, C = 2, 32, 8
    x = jax.random.normal(k1, (B, L, C), dtype=jnp.float32)
    res, mean = series_decomp(x, kernel_size)
    res = jax.block_until_ready(res)
    mean = jax.block_until_ready(mean)
    ref_res, ref_mean = _reference_series_decomp(x, kernel_size)
    assert mean.shape == ref_mean.shape and res.shape == ref_res.shape
    assert jnp.allclose(mean, ref_mean, atol=1e-5, rtol=1e-5), "mean mismatch"
    assert jnp.allclose(res, ref_res, atol=1e-5, rtol=1e-5), "residual mismatch"

    # Case 2: B*C is a multiple of 128 -> lane-dense relayout path.
    B2, L2, C2 = 16, 32, 8
    x2 = jax.random.normal(k2, (B2, L2, C2), dtype=jnp.float32)
    res2, mean2 = series_decomp(x2, kernel_size)
    res2 = jax.block_until_ready(res2)
    mean2 = jax.block_until_ready(mean2)
    ref_res2, ref_mean2 = _reference_series_decomp(x2, kernel_size)
    assert jnp.allclose(mean2, ref_mean2, atol=1e-5, rtol=1e-5), "mean mismatch (relayout)"
    assert jnp.allclose(res2, ref_res2, atol=1e-5, rtol=1e-5), "residual mismatch (relayout)"

    print("KERNEL_OK")
</pallas_src>

<mosaic_0001>
module attributes {stable_mosaic.version = 11 : i64} {
  func.func @_series_decomp_kernel(%arg0: i32, %arg1: i32, %arg2: memref<1x32x8xf32, #tpu.memory_space<vmem>>, %arg3: memref<1x32x8xf32, #tpu.memory_space<vmem>>, %arg4: memref<1x32x8xf32, #tpu.memory_space<vmem>>, %arg5: memref<1x56x8xf32, #tpu.memory_space<vmem>>) attributes {dimension_semantics = [#tpu.dimension_semantics<parallel>, #tpu.dimension_semantics<parallel>], iteration_bounds = array<i64: 2, 1>, scalar_prefetch = 0 : i64, scratch_operands = 1 : i64, tpu.core_type = #tpu.core_type<tc>, window_params = [{transform_indices = @transform_0, window_bounds = array<i64: 1, 32, 8>}, {transform_indices = @transform_1, window_bounds = array<i64: 1, 32, 8>}, {transform_indices = @transform_2, window_bounds = array<i64: 1, 32, 8>}]} {
    %c0 = arith.constant 0 : index
    %c0_0 = arith.constant 0 : index
    %c0_1 = arith.constant 0 : index
    %0 = vector.load %arg2[%c0, %c0_0, %c0_1] : memref<1x32x8xf32, #tpu.memory_space<vmem>>, vector<1x1x8xf32>
    %1 = vector.shape_cast %0 : vector<1x1x8xf32> to vector<1x1x8xf32>
    %2 = vector.broadcast %1 : vector<1x1x8xf32> to vector<1x12x8xf32>
    %c0_2 = arith.constant 0 : index
    %c0_3 = arith.constant 0 : index
    %c0_4 = arith.constant 0 : index
    %3 = vector.load %arg5[%c0_2, %c0_3, %c0_4] : memref<1x56x8xf32, #tpu.memory_space<vmem>>, vector<1x12x8xf32>
    tpu.vector_store %arg5[%c0_2, %c0_3, %c0_4], %2 {strides = array<i32>} : memref<1x56x8xf32, #tpu.memory_space<vmem>>, vector<1x12x8xf32>,
    %c0_5 = arith.constant 0 : index
    %c31 = arith.constant 31 : index
    %c0_6 = arith.constant 0 : index
    %4 = vector.load %arg2[%c0_5, %c31, %c0_6] : memref<1x32x8xf32, #tpu.memory_space<vmem>>, vector<1x1x8xf32>
    %5 = vector.shape_cast %4 : vector<1x1x8xf32> to vector<1x1x8xf32>
    %6 = vector.broadcast %5 : vector<1x1x8xf32> to vector<1x12x8xf32>
    %c0_7 = arith.constant 0 : index
    %c44 = arith.constant 44 : index
    %c0_8 = arith.constant 0 : index
    %7 = vector.load %arg5[%c0_7, %c44, %c0_8] : memref<1x56x8xf32, #tpu.memory_space<vmem>>, vector<1x12x8xf32>
    tpu.vector_store %arg5[%c0_7, %c44, %c0_8], %6 {strides = array<i32>} : memref<1x56x8xf32, #tpu.memory_space<vmem>>, vector<1x12x8xf32>,
    %c0_9 = arith.constant 0 : index
    %c0_10 = arith.constant 0 : index
    %c0_11 = arith.constant 0 : index
    %8 = vector.load %arg2[%c0_9, %c0_10, %c0_11] : memref<1x32x8xf32, #tpu.memory_space<vmem>>, vector<1x32x8xf32>
    %c0_12 = arith.constant 0 : index
    %c12 = arith.constant 12 : index
    %c0_13 = arith.constant 0 : index
    %9 = vector.load %arg5[%c0_12, %c12, %c0_13] : memref<1x56x8xf32, #tpu.memory_space<vmem>>, vector<1x32x8xf32>
    tpu.vector_store %arg5[%c0_12, %c12, %c0_13], %8 {strides = array<i32>} : memref<1x56x8xf32, #tpu.memory_space<vmem>>, vector<1x32x8xf32>,
    %c0_14 = arith.constant 0 : index
    %c0_15 = arith.constant 0 : index
    %c0_16 = arith.constant 0 : index
    %10 = vector.load %arg5[%c0_14, %c0_15, %c0_16] : memref<1x56x8xf32, #tpu.memory_space<vmem>>, vector<1x32x8xf32>
    %c0_17 = arith.constant 0 : index
    %c1 = arith.constant 1 : index
    %c0_18 = arith.constant 0 : index
    %11 = vector.load %arg5[%c0_17, %c1, %c0_18] : memref<1x56x8xf32, #tpu.memory_space<vmem>>, vector<1x32x8xf32>
    %12 = arith.addf %10, %11 : vector<1x32x8xf32>
    %c0_19 = arith.constant 0 : index
    %c2 = arith.constant 2 : index
    %c0_20 = arith.constant 0 : index
    %13 = vector.load %arg5[%c0_19, %c2, %c0_20] : memref<1x56x8xf32, #tpu.memory_space<vmem>>, vector<1x32x8xf32>
    %14 = arith.addf %12, %13 : vector<1x32x8xf32>
    %c0_21 = arith.constant 0 : index
    %c3 = arith.constant 3 : index
    %c0_22 = arith.constant 0 : index
    %15 = vector.load %arg5[%c0_21, %c3, %c0_22] : memref<1x56x8xf32, #tpu.memory_space<vmem>>, vector<1x32x8xf32>
    %16 = arith.addf %14, %15 : vector<1x32x8xf32>
    %c0_23 = arith.constant 0 : index
    %c4 = arith.constant 4 : index
    %c0_24 = arith.constant 0 : index
    %17 = vector.load %arg5[%c0_23, %c4, %c0_24] : memref<1x56x8xf32, #tpu.memory_space<vmem>>, vector<1x32x8xf32>
    %18 = arith.addf %16, %17 : vector<1x32x8xf32>
    %c0_25 = arith.constant 0 : index
    %c5 = arith.constant 5 : index
    %c0_26 = arith.constant 0 : index
    %19 = vector.load %arg5[%c0_25, %c5, %c0_26] : memref<1x56x8xf32, #tpu.memory_space<vmem>>, vector<1x32x8xf32>
    %20 = arith.addf %18, %19 : vector<1x32x8xf32>
    %c0_27 = arith.constant 0 : index
    %c6 = arith.constant 6 : index
    %c0_28 = arith.constant 0 : index
    %21 = vector.load %arg5[%c0_27, %c6, %c0_28] : memref<1x56x8xf32, #tpu.memory_space<vmem>>, vector<1x32x8xf32>
    %22 = arith.addf %20, %21 : vector<1x32x8xf32>
    %c0_29 = arith.constant 0 : index
    %c7 = arith.constant 7 : index
    %c0_30 = arith.constant 0 : index
    %23 = vector.load %arg5[%c0_29, %c7, %c0_30] : memref<1x56x8xf32, #tpu.memory_space<vmem>>, vector<1x32x8xf32>
    %24 = arith.addf %22, %23 : vector<1x32x8xf32>
    %c0_31 = arith.constant 0 : index
    %c8 = arith.constant 8 : index
    %c0_32 = arith.constant 0 : index
    %25 = vector.load %arg5[%c0_31, %c8, %c0_32] : memref<1x56x8xf32, #tpu.memory_space<vmem>>, vector<1x32x8xf32>
    %26 = arith.addf %24, %25 : vector<1x32x8xf32>
    %c0_33 = arith.constant 0 : index
    %c9 = arith.constant 9 : index
    %c0_34 = arith.constant 0 : index
    %27 = vector.load %arg5[%c0_33, %c9, %c0_34] : memref<1x56x8xf32, #tpu.memory_space<vmem>>, vector<1x32x8xf32>
    %28 = arith.addf %26, %27 : vector<1x32x8xf32>
    %c0_35 = arith.constant 0 : index
    %c10 = arith.constant 10 : index
    %c0_36 = arith.constant 0 : index
    %29 = vector.load %arg5[%c0_35, %c10, %c0_36] : memref<1x56x8xf32, #tpu.memory_space<vmem>>, vector<1x32x8xf32>
    %30 = arith.addf %28, %29 : vector<1x32x8xf32>
    %c0_37 = arith.constant 0 : index
    %c11 = arith.constant 11 : index
    %c0_38 = arith.constant 0 : index
    %31 = vector.load %arg5[%c0_37, %c11, %c0_38] : memref<1x56x8xf32, #tpu.memory_space<vmem>>, vector<1x32x8xf32>
    %32 = arith.addf %30, %31 : vector<1x32x8xf32>
    %c0_39 = arith.constant 0 : index
    %c12_40 = arith.constant 12 : index
    %c0_41 = arith.constant 0 : index
    %33 = vector.load %arg5[%c0_39, %c12_40, %c0_41] : memref<1x56x8xf32, #tpu.memory_space<vmem>>, vector<1x32x8xf32>
    %34 = arith.addf %32, %33 : vector<1x32x8xf32>
    %c0_42 = arith.constant 0 : index
    %c13 = arith.constant 13 : index
    %c0_43 = arith.constant 0 : index
    %35 = vector.load %arg5[%c0_42, %c13, %c0_43] : memref<1x56x8xf32, #tpu.memory_space<vmem>>, vector<1x32x8xf32>
    %36 = arith.addf %34, %35 : vector<1x32x8xf32>
    %c0_44 = arith.constant 0 : index
    %c14 = arith.constant 14 : index
    %c0_45 = arith.constant 0 : index
    %37 = vector.load %arg5[%c0_44, %c14, %c0_45] : memref<1x56x8xf32, #tpu.memory_space<vmem>>, vector<1x32x8xf32>
    %38 = arith.addf %36, %37 : vector<1x32x8xf32>
    %c0_46 = arith.constant 0 : index
    %c15 = arith.constant 15 : index
    %c0_47 = arith.constant 0 : index
    %39 = vector.load %arg5[%c0_46, %c15, %c0_47] : memref<1x56x8xf32, #tpu.memory_space<vmem>>, vector<1x32x8xf32>
    %40 = arith.addf %38, %39 : vector<1x32x8xf32>
    %c0_48 = arith.constant 0 : index
    %c16 = arith.constant 16 : index
    %c0_49 = arith.constant 0 : index
    %41 = vector.load %arg5[%c0_48, %c16, %c0_49] : memref<1x56x8xf32, #tpu.memory_space<vmem>>, vector<1x32x8xf32>
    %42 = arith.addf %40, %41 : vector<1x32x8xf32>
    %c0_50 = arith.constant 0 : index
    %c17 = arith.constant 17 : index
    %c0_51 = arith.constant 0 : index
    %43 = vector.load %arg5[%c0_50, %c17, %c0_51] : memref<1x56x8xf32, #tpu.memory_space<vmem>>, vector<1x32x8xf32>
    %44 = arith.addf %42, %43 : vector<1x32x8xf32>
    %c0_52 = arith.constant 0 : index
    %c18 = arith.constant 18 : index
    %c0_53 = arith.constant 0 : index
    %45 = vector.load %arg5[%c0_52, %c18, %c0_53] : memref<1x56x8xf32, #tpu.memory_space<vmem>>, vector<1x32x8xf32>
    %46 = arith.addf %44, %45 : vector<1x32x8xf32>
    %c0_54 = arith.constant 0 : index
    %c19 = arith.constant 19 : index
    %c0_55 = arith.constant 0 : index
    %47 = vector.load %arg5[%c0_54, %c19, %c0_55] : memref<1x56x8xf32, #tpu.memory_space<vmem>>, vector<1x32x8xf32>
    %48 = arith.addf %46, %47 : vector<1x32x8xf32>
    %c0_56 = arith.constant 0 : index
    %c20 = arith.constant 20 : index
    %c0_57 = arith.constant 0 : index
    %49 = vector.load %arg5[%c0_56, %c20, %c0_57] : memref<1x56x8xf32, #tpu.memory_space<vmem>>, vector<1x32x8xf32>
    %50 = arith.addf %48, %49 : vector<1x32x8xf32>
    %c0_58 = arith.constant 0 : index
    %c21 = arith.constant 21 : index
    %c0_59 = arith.constant 0 : index
    %51 = vector.load %arg5[%c0_58, %c21, %c0_59] : memref<1x56x8xf32, #tpu.memory_space<vmem>>, vector<1x32x8xf32>
    %52 = arith.addf %50, %51 : vector<1x32x8xf32>
    %c0_60 = arith.constant 0 : index
    %c22 = arith.constant 22 : index
    %c0_61 = arith.constant 0 : index
    %53 = vector.load %arg5[%c0_60, %c22, %c0_61] : memref<1x56x8xf32, #tpu.memory_space<vmem>>, vector<1x32x8xf32>
    %54 = arith.addf %52, %53 : vector<1x32x8xf32>
    %c0_62 = arith.constant 0 : index
    %c23 = arith.constant 23 : index
    %c0_63 = arith.constant 0 : index
    %55 = vector.load %arg5[%c0_62, %c23, %c0_63] : memref<1x56x8xf32, #tpu.memory_space<vmem>>, vector<1x32x8xf32>
    %56 = arith.addf %54, %55 : vector<1x32x8xf32>
    %c0_64 = arith.constant 0 : index
    %c24 = arith.constant 24 : index
    %c0_65 = arith.constant 0 : index
    %57 = vector.load %arg5[%c0_64, %c24, %c0_65] : memref<1x56x8xf32, #tpu.memory_space<vmem>>, vector<1x32x8xf32>
    %58 = arith.addf %56, %57 : vector<1x32x8xf32>
    %cst = arith.constant 4.000000e-02 : f32
    %59 = vector.broadcast %cst : f32 to vector<1x32x8xf32>
    %60 = arith.mulf %58, %59 : vector<1x32x8xf32>
    %c0_66 = arith.constant 0 : index
    %c0_67 = arith.constant 0 : index
    %c0_68 = arith.constant 0 : index
    %61 = vector.load %arg4[%c0_66, %c0_67, %c0_68] : memref<1x32x8xf32, #tpu.memory_space<vmem>>, vector<1x32x8xf32>
    tpu.vector_store %arg4[%c0_66, %c0_67, %c0_68], %60 {strides = array<i32>} : memref<1x32x8xf32, #tpu.memory_space<vmem>>, vector<1x32x8xf32>,
    %c0_69 = arith.constant 0 : index
    %c0_70 = arith.constant 0 : index
    %c0_71 = arith.constant 0 : index
    %62 = vector.load %arg2[%c0_69, %c0_70, %c0_71] : memref<1x32x8xf32, #tpu.memory_space<vmem>>, vector<1x32x8xf32>
    %63 = arith.subf %62, %60 : vector<1x32x8xf32>
    %c0_72 = arith.constant 0 : index
    %c0_73 = arith.constant 0 : index
    %c0_74 = arith.constant 0 : index
    %64 = vector.load %arg3[%c0_72, %c0_73, %c0_74] : memref<1x32x8xf32, #tpu.memory_space<vmem>>, vector<1x32x8xf32>
    tpu.vector_store %arg3[%c0_72, %c0_73, %c0_74], %63 {strides = array<i32>} : memref<1x32x8xf32, #tpu.memory_space<vmem>>, vector<1x32x8xf32>,
    return
  }
  func.func @transform_0(%arg0: i32, %arg1: i32) -> (i32, i32, i32) {
    %c0_i32 = arith.constant 0 : i32
    %c0_i32_0 = arith.constant 0 : i32
    return %arg0, %c0_i32, %arg1 : i32, i32, i32
  }
  func.func @transform_1(%arg0: i32, %arg1: i32) -> (i32, i32, i32) {
    %c0_i32 = arith.constant 0 : i32
    %c0_i32_0 = arith.constant 0 : i32
    return %arg0, %c0_i32, %arg1 : i32, i32, i32
  }
  func.func @transform_2(%arg0: i32, %arg1: i32) -> (i32, i32, i32) {
    %c0_i32 = arith.constant 0 : i32
    %c0_i32_0 = arith.constant 0 : i32
    return %arg0, %c0_i32, %arg1 : i32, i32, i32
  }
}

</mosaic_0001>

<bundles_post_ra>
// kernel: tpu_custom_call.1
= control target key start
LH: loop header
LB: loop body
LE: loop exit
PB: predicated region body
PF: predicated region fallthrough
CT: control target
= control target key end

     0   :  { %s596_s9 = smov 0   ;;  %s598_s10 = smov 0   ;;  %s753_s0 = inlined_call_operand.vmem [shape: f32[2,32,8], index: 0, kind: input, shape index: {}]   ;;  %s754_s1 = inlined_call_operand.vmem [shape: f32[2,32,8], index: 1, kind: output, shape index: {0}]   ;;  %s755_s2 = inlined_call_operand.vmem [shape: f32[2,32,8], index: 2, kind: output, shape index: {1}]  }
   0x1   :  { %s600_s11 = smov 0  }
   0x2 LB: > { %s25_s12 = sadd.s32 1, %s575_s10  ;;  %p519_p0 = scmp.ge.s32.totalorder %s579_s11, 1  ;;  %s579_s11 = sphi %s600_s11, %s13_s11   ;;  %s575_s10 = sphi %s598_s10, %s757_s10   ;;  %s571_s9 = sphi %s596_s9, %s756_s9  }
   0x3   : > { %p27_p1 = scmp.ge.s32.totalorder %s25_s12, 2  ;;  %p136_p2 = scmp.lt.s32.totalorder %s579_s11, 3 }
   0x5   : > { %s759_s12 = smov (%p27_p1, %s25_s12), 0  ;;  %p137_p3 = pnand %p519_p0, %p136_p2 }
   0x6   : > { %p172_p4 = scmp.lt.s32.totalorder (!%p137_p3), %s571_s9, 1 }
   0x7   : > { %140 = sbr.rel (%p137_p3) target bundleno = 81 (0x51), region = 24 }
   0xc   : > { %s761_s9 = smov (!%p172_p4, %s571_s9), 1  ;;  %vm201_vm0 = vcmask 64512   ;;  %vm203_vm1 = vcmask 60416  }
   0xd   : > { %s614_s13 = sshll.u32 %s761_s9, 5 }
   0xe   : > { %s179_s16 = scalar_lea.vmem %s753_s0, %s614_s13  ;;  %s195_s19 = scalar_lea.vmem %s755_s2, %s614_s13 }
   0xf   : > { %v526_v0 = vld [vmem:[%s179_s16] ss:$0 sm:$0xff]  ;;  %v622_v2 = vld [vmem:[%s179_s16 + $0x8] sm:$0xff]  ;;  %v629_v3 = vld [vmem:[%s179_s16 + $0x10] sm:$0xff]  ;;  %s187_s22 = scalar_lea.vmem %s754_s1, %s614_s13 }
  0x10   : > { %v620_v1 = vld [vmem:[%s179_s16] sm:$0xff]  ;;  %202 = vst.msk [vmem:[#allocation2] sm:$0xff] %vm201_vm0, %v526_v0  ;;  %217 = vst.msk [vmem:[#allocation2 + $0x14] sm:$0xff] %vm201_vm0, %v622_v2  ;;  %v631_v4 = vld [vmem:[%s179_s16 + $0x18] sm:$0xff] }
  0x11   : > { %204 = vst.msk [vmem:[#allocation2 + $0x8] sm:$0xf] %vm203_vm1, %v526_v0  ;;  %v527_v5 = vld [vmem:[%s179_s16 + $0x1f] ss:$0 sm:$0xff] }
  0x12   : > { %216 = vst.msk [vmem:[#allocation2 + $0xc] sm:$0xff] %vm201_vm0, %v620_v1  ;;  %218 = vst.msk [vmem:[#allocation2 + $0x1c] sm:$0xff] %vm201_vm0, %v629_v3 }
  0x13   : > { %219 = vst.msk [vmem:[#allocation2 + $0x24] sm:$0xff] %vm201_vm0, %v631_v4  ;;  %210 = vst.msk [vmem:[#allocation2 + $0x2c] sm:$0xff] %vm201_vm0, %v527_v5 }
  0x14   : > { %211 = vst.msk [vmem:[#allocation2 + $0x34] sm:$0xf] %vm203_vm1, %v527_v5 }
  0x17   : > { %v220_v6 = vld [vmem:[#allocation2] sm:$0xff]  ;;  %v662_v41 = vld [vmem:[#allocation2 + $0x14] sm:$0xff] }
  0x18   : > { %v224_v7 = vld [vmem:[#allocation2 + $0x1] sm:$0xff] }
  0x19   : > { %v228_v8 = vadd.f32 %v224_v7, %v220_v6  ;;  %v221_v9 = vld [vmem:[#allocation2 + $0x8] sm:$0xff]  ;;  %v638_v16 = vld [vmem:[#allocation2 + $0x10] sm:$0xff]  ;;  %v640_v17 = vld [vmem:[#allocation2 + $0x18] sm:$0xff] }
  0x1a   : > { %v232_v10 = vld [vmem:[#allocation2 + $0x2] sm:$0xff]  ;;  %v233_v15 = vld [vmem:[#allocation2 + $0xa] sm:$0xff]  ;;  %v644_v19 = vld [vmem:[#allocation2 + $0x19] sm:$0xff] }
  0x1b   : > { %v225_v11 = vld [vmem:[#allocation2 + $0x9] sm:$0xff]  ;;  %v236_v12 = vadd.f32 %v232_v10, %v228_v8  ;;  %v642_v18 = vld [vmem:[#allocation2 + $0x11] sm:$0xff]  ;;  %v231_v24 = vadd.f32 %v644_v19, %v640_v17  ;;  %v652_v26 = vld [vmem:[#allocation2 + $0x1a] sm:$0xff] }
  0x1c   : > { %v240_v13 = vld [vmem:[#allocation2 + $0x3] sm:$0xff]  ;;  %v229_v14 = vadd.f32 %v225_v11, %v221_v9  ;;  %v230_v23 = vadd.f32 %v642_v18, %v638_v16  ;;  %v650_v25 = vld [vmem:[#allocation2 + $0x12] sm:$0xff]  ;;  %v658_v34 = vld [vmem:[#allocation2 + $0x1b] sm:$0xff] }
  0x1d   : > { %v244_v20 = vadd.f32 %v240_v13, %v236_v12  ;;  %v248_v21 = vld [vmem:[#allocation2 + $0x4] sm:$0xff]  ;;  %v239_v31 = vadd.f32 %v652_v26, %v231_v24  ;;  %v656_v33 = vld [vmem:[#allocation2 + $0x13] sm:$0xff]  ;;  %v664_v43 = vld [vmem:[#allocation2 + $0x1c] sm:$0xff] }
  0x1e   : > { %v237_v22 = vadd.f32 %v233_v15, %v229_v14  ;;  %v241_v27 = vld [vmem:[#allocation2 + $0xb] sm:$0xff]  ;;  %v238_v30 = vadd.f32 %v650_v25, %v230_v23  ;;  %v668_v49 = vld [vmem:[#allocation2 + $0x15] sm:$0xff]  ;;  %v670_v51 = vld [vmem:[#allocation2 + $0x1d] sm:$0xff] }
  0x1f   : > { %v252_v28 = vadd.f32 %v248_v21, %v244_v20  ;;  %v256_v29 = vld [vmem:[#allocation2 + $0x5] sm:$0xff]  ;;  %v247_v39 = vadd.f32 %v658_v34, %v239_v31  ;;  %v257_v42 = vld [vmem:[#allocation2 + $0xd] sm:$0xff]  ;;  %v674_v56 = vld [vmem:[#allocation2 + $0x16] sm:$0xff] }
  0x20   : > { %v245_v32 = vadd.f32 %v241_v27, %v237_v22  ;;  %v249_v35 = vld [vmem:[#allocation2 + $0xc] sm:$0xff]  ;;  %v246_v38 = vadd.f32 %v656_v33, %v238_v30  ;;  %v676_v58 = vld [vmem:[#allocation2 + $0x1e] sm:$0xff] }
  0x21   : > { %v260_v36 = vadd.f32 %v256_v29, %v252_v28  ;;  %v264_v37 = vld [vmem:[#allocation2 + $0x6] sm:$0xff]  ;;  %v255_v48 = vadd.f32 %v664_v43, %v247_v39  ;;  %v265_v50 = vld [vmem:[#allocation2 + $0xe] sm:$0xff]  ;;  %v680_v63 = vld [vmem:[#allocation2 + $0x17] sm:$0xff] }
  0x22   : > { %v253_v40 = vadd.f32 %v249_v35, %v245_v32  ;;  %v272_v45 = vld [vmem:[#allocation2 + $0x7] sm:$0xff]  ;;  %v254_v46 = vadd.f32 %v662_v41, %v246_v38  ;;  %v273_v57 = vld [vmem:[#allocation2 + $0xf] sm:$0xff]  ;;  %v682_v0 = vld [vmem:[#allocation2 + $0x1f] sm:$0xff] }
  0x23   : > { %v268_v44 = vadd.f32 %v264_v37, %v260_v36  ;;  %v263_v55 = vadd.f32 %v670_v51, %v255_v48  ;;  %v687_v10 = vld [vmem:[#allocation2 + $0x20] sm:$0xff] }
  0x24   : > { %v261_v47 = vadd.f32 %v257_v42, %v253_v40  ;;  %v262_v53 = vadd.f32 %v668_v49, %v254_v46  ;;  %v285_v20 = vld [vmem:[#allocation2 + $0x21] sm:$0xff] }
  0x25   : > { %v276_v52 = vadd.f32 %v272_v45, %v268_v44  ;;  %v271_v62 = vadd.f32 %v676_v58, %v263_v55  ;;  %v290_v24 = vld [vmem:[#allocation2 + $0x22] sm:$0xff] }
  0x26   : > { %v269_v54 = vadd.f32 %v265_v50, %v261_v47  ;;  %v270_v60 = vadd.f32 %v674_v56, %v262_v53  ;;  %v295_v32 = vld [vmem:[#allocation2 + $0x23] sm:$0xff] }
  0x27   : > { %v281_v59 = vadd.f32 %v276_v52, %v221_v9  ;;  %v279_v8 = vadd.f32 %v682_v0, %v271_v62  ;;  %v300_v39 = vld [vmem:[#allocation2 + $0x24] sm:$0xff] }
  0x28   : > { %v277_v61 = vadd.f32 %v273_v57, %v269_v54  ;;  %v278_v6 = vadd.f32 %v680_v63, %v270_v60  ;;  %v305_v46 = vld [vmem:[#allocation2 + $0x25] sm:$0xff] }
  0x29   : > { %v286_v5 = vadd.f32 %v281_v59, %v225_v11  ;;  %v284_v14 = vadd.f32 %v687_v10, %v279_v8  ;;  %v310_v53 = vld [vmem:[#allocation2 + $0x26] sm:$0xff] }
  0x2a   : > { %v282_v7 = vadd.f32 %v277_v61, %v638_v16  ;;  %v283_v9 = vadd.f32 %v278_v6, %v640_v17  ;;  %v315_v60 = vld [vmem:[#allocation2 + $0x27] sm:$0xff] }
  0x2b   : > { %v291_v13 = vadd.f32 %v286_v5, %v233_v15  ;;  %v289_v23 = vadd.f32 %v285_v20, %v284_v14 }
  0x2c   : > { %v287_v12 = vadd.f32 %v282_v7, %v642_v18  ;;  %v288_v21 = vadd.f32 %v283_v9, %v644_v19 }
  0x2d   : > { %v296_v22 = vadd.f32 %v291_v13, %v241_v27  ;;  %v294_v31 = vadd.f32 %v290_v24, %v289_v23 }
  0x2e   : > { %v292_v11 = vadd.f32 %v287_v12, %v650_v25  ;;  %v293_v28 = vadd.f32 %v288_v21, %v652_v26 }
  0x2f   : > { %v301_v30 = vadd.f32 %v296_v22, %v249_v35  ;;  %v299_v38 = vadd.f32 %v295_v32, %v294_v31 }
  0x30   : > { %v297_v29 = vadd.f32 %v292_v11, %v656_v33  ;;  %v298_v36 = vadd.f32 %v293_v28, %v658_v34  ;;  %v330_v11 = vld [vmem:[#allocation2 + $0x2a] sm:$0xff] }
  0x31   : > { %v306_v37 = vadd.f32 %v301_v30, %v257_v42  ;;  %v304_v45 = vadd.f32 %v300_v39, %v299_v38  ;;  %v350_v38 = vld [vmem:[#allocation2 + $0x2e] sm:$0xff] }
  0x32   : > { %v302_v15 = vadd.f32 %v297_v29, %v662_v41  ;;  %v303_v27 = vadd.f32 %v298_v36, %v664_v43 }
  0x33   : > { %v311_v44 = vadd.f32 %v306_v37, %v265_v50  ;;  %v309_v52 = vadd.f32 %v305_v46, %v304_v45 }
  0x34   : > { %v307_v40 = vadd.f32 %v302_v15, %v668_v49  ;;  %v308_v35 = vadd.f32 %v303_v27, %v670_v51 }
  0x35   : > { %v316_v48 = vadd.f32 %v311_v44, %v273_v57  ;;  %v314_v59 = vadd.f32 %v310_v53, %v309_v52  ;;  %v320_v57 = vld [vmem:[#allocation2 + $0x28] sm:$0xff] }
  0x36   : > { %v312_v47 = vadd.f32 %v307_v40, %v674_v56  ;;  %v313_v55 = vadd.f32 %v308_v35, %v676_v58 }
  0x37   : > { %v321_v42 = vadd.f32 %v316_v48, %v638_v16  ;;  %v319_v5 = vadd.f32 %v315_v60, %v314_v59  ;;  %v325_v16 = vld [vmem:[#allocation2 + $0x29] sm:$0xff] }
  0x38   : > { %v317_v54 = vadd.f32 %v312_v47, %v680_v63  ;;  %v318_v62 = vadd.f32 %v313_v55, %v682_v0 }
  0x39   : > { %v326_v61 = vadd.f32 %v321_v42, %v642_v18  ;;  %v324_v9 = vadd.f32 %v320_v57, %v319_v5 }
  0x3a   : > { %v322_v50 = vadd.f32 %v317_v54, %v640_v17  ;;  %v323_v8 = vadd.f32 %v318_v62, %v687_v10 }
  0x3b   : > { %v331_v7 = vadd.f32 %v326_v61, %v650_v25  ;;  %v329_v21 = vadd.f32 %v325_v16, %v324_v9 }
  0x3c   : > { %v327_v6 = vadd.f32 %v322_v50, %v644_v19  ;;  %v328_v13 = vadd.f32 %v323_v8, %v285_v20  ;;  %v335_v19 = vld [vmem:[#allocation2 + $0x2b] sm:$0xff] }
  0x3d   : > { %v336_v12 = vadd.f32 %v331_v7, %v656_v33  ;;  %v334_v28 = vadd.f32 %v330_v11, %v329_v21  ;;  %v340_v33 = vld [vmem:[#allocation2 + $0x2c] sm:$0xff] }
  0x3e   : > { %v332_v14 = vadd.f32 %v327_v6, %v652_v26  ;;  %v333_v22 = vadd.f32 %v328_v13, %v290_v24 }
  0x3f   : > { %v341_v18 = vadd.f32 %v336_v12, %v662_v41  ;;  %v339_v31 = vadd.f32 %v335_v19, %v334_v28  ;;  %v345_v41 = vld [vmem:[#allocation2 + $0x2d] sm:$0xff] }
  0x40   : > { %v337_v23 = vadd.f32 %v332_v14, %v658_v34  ;;  %v338_v30 = vadd.f32 %v333_v22, %v295_v32 }
  0x41   : > { %v346_v25 = vadd.f32 %v341_v18, %v668_v49  ;;  %v344_v15 = vadd.f32 %v340_v33, %v339_v31 }
  0x42   : > { %v342_v29 = vadd.f32 %v337_v23, %v664_v43  ;;  %v343_v36 = vadd.f32 %v338_v30, %v300_v39 }
  0x43   : > { %v351_v20 = vadd.f32 %v346_v25, %v674_v56  ;;  %v349_v49 = vadd.f32 %v345_v41, %v344_v15 }
  0x44   : > { %v347_v26 = vadd.f32 %v342_v29, %v670_v51  ;;  %v348_v37 = vadd.f32 %v343_v36, %v305_v46  ;;  %v355_v51 = vld [vmem:[#allocation2 + $0x2f] sm:$0xff] }
  0x45   : > { %v356_v24 = vadd.f32 %v351_v20, %v680_v63  ;;  %v354_v44 = vadd.f32 %v350_v38, %v349_v49 }
  0x46   : > { %v352_v34 = vadd.f32 %v347_v26, %v676_v58  ;;  %v353_v40 = vadd.f32 %v348_v37, %v310_v53  ;;  %v360_v58 = vld [vmem:[#allocation2 + $0x30] sm:$0xff] }
  0x47   : > { %v361_v43 = vadd.f32 %v356_v24, %v640_v17  ;;  %v359_v27 = vadd.f32 %v355_v51, %v354_v44 }
  0x48   : > { %v357_v32 = vadd.f32 %v352_v34, %v682_v0  ;;  %v358_v39 = vadd.f32 %v353_v40, %v315_v60 }
  0x49   : > { %v365_v56 = vmul.f32 0.04, %v361_v43  ;;  %v364_v45 = vadd.f32 %v360_v58, %v359_v27 }
  0x4a   : > { %v362_v63 = vadd.f32 %v357_v32, %v687_v10  ;;  %v363_v0 = vadd.f32 %v358_v39, %v320_v57 }
  0x4b   : > { %369 = vst.msk [vmem:[%s195_s19] sm:$0xff] %vm201_vm0, %v365_v56  ;;  %v377_v46 = vsub.f32 %v620_v1, %v365_v56  ;;  %v368_v48 = vmul.f32 0.04, %v364_v45 }
  0x4c   : > { %v366_v17 = vmul.f32 0.04, %v362_v63  ;;  %v367_v47 = vmul.f32 0.04, %v363_v0 }
  0x4d   : > { %381 = vst.msk [vmem:[%s187_s22] sm:$0xff] %vm201_vm0, %v377_v46  ;;  %372 = vst.msk [vmem:[%s195_s19 + $0x18] sm:$0xff] %vm201_vm0, %v368_v48  ;;  %v380_v52 = vsub.f32 %v631_v4, %v368_v48 }
  0x4e   : > { %370 = vst.msk [vmem:[%s195_s19 + $0x8] sm:$0xff] %vm201_vm0, %v366_v17  ;;  %v378_v10 = vsub.f32 %v622_v2, %v366_v17  ;;  %371 = vst.msk [vmem:[%s195_s19 + $0x10] sm:$0xff] %vm201_vm0, %v367_v47  ;;  %v379_v35 = vsub.f32 %v629_v3, %v367_v47 }
  0x4f   : > { %384 = vst.msk [vmem:[%s187_s22 + $0x18] sm:$0xff] %vm201_vm0, %v380_v52 }
  0x50   : > { %382 = vst.msk [vmem:[%s187_s22 + $0x8] sm:$0xff] %vm201_vm0, %v378_v10  ;;  %383 = vst.msk [vmem:[%s187_s22 + $0x10] sm:$0xff] %vm201_vm0, %v379_v35 }
  0x51 PF: > { %s13_s11 = sadd.s32 1, %s579_s11   ;;  %s756_s9 = smov %s575_s10 }
  0x52   : > { %p10_p5 = scmp.ge.s32.totalorder %s13_s11, 4   ;;  %s757_s10 = smov %s759_s12 }
  0x54   :  { %12 = sbr.rel (!%p10_p5) target bundleno = 2 (0x2), region = 66 }

</bundles_post_ra>
